<compile_context>
chip_gen: v5e
topology: v5e:2x2
jax: 0.10.0
libtpu: 0.0.40
codegen_flags: <defaults>
</compile_context>

<pallas_src>
import functools

import jax
import jax.numpy as jnp
from jax import lax
from jax.experimental import pallas as pl
from jax.experimental.pallas import tpu as pltpu


# ----------------------------- Pallas kernels ------------------------------
def _pool_mlp_kernel(x_ref, prior_ref, w1a_ref, w1b_ref, b1_ref,
                     w2_ref, b2_ref, w3_ref, b3_ref,
                     imp_ref, l1_ref, acc_ref, *, hw, ts, needs_mask):
    """Tiled global average pool over H*W fused with the attention MLP.

    Grid = (batch, spatial_tiles); per batch row the f32 sum accumulates in
    a VMEM scratch, and on the last spatial step the mean is finalized and
    the tiny MLP (concat folded into two matmuls) produces imp and L1(att).
    """
    si = pl.program_id(1)

    @pl.when(si == 0)
    def _():
        acc_ref[...] = jnp.zeros_like(acc_ref)

    x = x_ref[...].astype(jnp.float32)                   # (1, C, ts)
    if needs_mask:
        # Tail block may extend past H*W: zero the padded lanes before summing.
        lane = lax.broadcasted_iota(jnp.int32, x.shape, 2)
        x = jnp.where(lane + si * ts < hw, x, 0.0)
    acc_ref[...] += jnp.sum(x, axis=-1)                   # (1, C), pure add on hot path

    @pl.when(si == pl.num_programs(1) - 1)
    def _():
        avg = acc_ref[...] * (1.0 / float(hw))            # finalize mean once
        prior = prior_ref[0].astype(jnp.float32)          # (1, C)
        # concat([avg, prior]) @ W1  ==  avg @ W1[:C] + prior @ W1[C:]
        h = (jnp.dot(avg, w1a_ref[...], preferred_element_type=jnp.float32)
             + jnp.dot(prior, w1b_ref[...], preferred_element_type=jnp.float32)
             + b1_ref[...])
        h = jnp.maximum(h, 0.0)
        h = jnp.dot(h, w2_ref[...], preferred_element_type=jnp.float32) + b2_ref[...]
        h = jnp.maximum(h, 0.0)
        att = jnp.tanh(
            jnp.dot(h, w3_ref[...], preferred_element_type=jnp.float32) + b3_ref[...])
        imp_ref[0] = jnp.maximum(att * prior, 0.0)                       # (1, C)
        l1_ref[0] = jnp.sum(jnp.abs(att), axis=1, keepdims=True)         # (1, 1)


def _scale_kernel(x_ref, imp_ref, o_ref):
    """out[b, c, s] = act[b, c, s] * imp[b, c]  (broadcast along the lane axis)."""
    x = x_ref[...].astype(jnp.float32)                    # (B, C, ts)
    imp = imp_ref[...].astype(jnp.float32)                # (B, C), VMEM-resident
    o_ref[...] = (x * imp[:, :, None]).astype(o_ref.dtype)


# ------------------------------- wrappers -----------------------------------
def _tpu_vmem_capacity():
    try:
        return int(pltpu.get_tpu_info().vmem_capacity_bytes)
    except Exception:
        return 128 << 20            # conservative fallback (v5e/v6e size)


def _pick_spatial_tile(hw, b, c, itemsize, max_bytes):
    """Largest multiple-of-128 spatial tile whose (B, C, tile) block fits the
    per-buffer budget.  hw <= 128 uses the full extent (always legal)."""
    if hw <= 128:
        return hw
    per_col = max(1, b * c * itemsize)
    t = (max_bytes // per_col) // 128 * 128
    t = max(128, t)
    cap = hw if hw % 128 == 0 else (hw // 128) * 128
    return int(min(t, cap))


def class_prior_forward(act_nchw, class_prior, params, *, spatial_tile=None):
    """Forward pass matching ClassPriorModule.forward.

    Returns (imp_vector[:, :, None, None] * act  [NCHW],
             mean_b(sum_c |attention_vector|))."""
    b, c, h, w = act_nchw.shape
    hw = h * w
    act_dtype = act_nchw.dtype
    itemsize = jnp.dtype(act_dtype).itemsize

    # Free layout: NCHW is already contiguous as (B, C, H*W).
    act = act_nchw.reshape(b, c, hw)

    cap = _tpu_vmem_capacity()
    per_buf = max(1 << 20, min(8 << 20, cap // 16))       # ~8 MiB v5e/v6e, ~4 MiB v7x

    ts = spatial_tile if spatial_tile is not None else \
        _pick_spatial_tile(hw, b, c, itemsize, per_buf)
    ts = min(int(ts), hw)
    if ts != hw and ts % 128 != 0:                         # sanitize bad user tile
        ts = _pick_spatial_tile(hw, b, c, itemsize, per_buf)
    n_tiles = pl.cdiv(hw, ts)
    needs_mask = (hw % ts) != 0

    block_bytes = b * c * ts * itemsize
    # scale kernel ~ 2 in-bufs + 2 out-bufs (+ tiny resident imp); keep headroom.
    vmem_limit = int(min(max(cap - (8 << 20), 16 << 20),
                         max(32 << 20, 5 * block_bytes)))

    h1 = params["w1"].shape[1]
    h2 = params["w2"].shape[1]
    w1a = params["w1"][:c]                                 # (C, h1)
    w1b = params["w1"][c:]                                 # (C, h1)
    prior3 = class_prior.reshape(b, 1, c).astype(jnp.float32)

    pool_mlp = functools.partial(_pool_mlp_kernel, hw=hw, ts=ts, needs_mask=needs_mask)

    # ---- 1) fused global-average-pool + attention MLP ----
    imp3, l1_rows = pl.pallas_call(
        pool_mlp,
        out_shape=(jax.ShapeDtypeStruct((b, 1, c), jnp.float32),
                   jax.ShapeDtypeStruct((b, 1, 1), jnp.float32)),
        grid=(b, n_tiles),
        in_specs=[
            pl.BlockSpec((1, c, ts), lambda bi, si: (bi, 0, si)),   # act tiles stream
            pl.BlockSpec((1, 1, c), lambda bi, si: (bi, 0, 0)),     # prior (resident per row)
            pl.BlockSpec((c, h1), lambda bi, si: (0, 0)),           # W1[:C]
            pl.BlockSpec((c, h1), lambda bi, si: (0, 0)),           # W1[C:]
            pl.BlockSpec((1, h1), lambda bi, si: (0, 0)),           # b1
            pl.BlockSpec((h1, h2), lambda bi, si: (0, 0)),          # W2
            pl.BlockSpec((1, h2), lambda bi, si: (0, 0)),           # b2
            pl.BlockSpec((h2, c), lambda bi, si: (0, 0)),           # W3
            pl.BlockSpec((1, c), lambda bi, si: (0, 0)),            # b3
        ],
        out_specs=(
            pl.BlockSpec((1, 1, c), lambda bi, si: (bi, 0, 0)),     # imp (written on last step)
            pl.BlockSpec((1, 1, 1), lambda bi, si: (bi, 0, 0)),     # per-row L1(att)
        ),
        scratch_shapes=[pltpu.VMEM((1, c), jnp.float32)],           # f32 sum accumulator
        compiler_params=pltpu.CompilerParams(
            dimension_semantics=("parallel", "arbitrary"),
            vmem_limit_bytes=vmem_limit),
        cost_estimate=pl.CostEstimate(
            flops=b * hw * c, transcendentals=b * c,
            bytes_accessed=b * hw * c * itemsize),
    )(act, prior3, w1a, w1b,
      params["b1"].reshape(1, h1), params["w2"], params["b2"].reshape(1, h2),
      params["w3"], params["b3"].reshape(1, c))

    imp = imp3.reshape(b, c)
    l1_mean = jnp.mean(l1_rows)

    # ---- 2) broadcast rescale of the activation (tiled, fully parallel) ----
    out = pl.pallas_call(
        _scale_kernel,
        out_shape=jax.ShapeDtypeStruct((b, c, hw), act_dtype),
        grid=(n_tiles,),
        in_specs=[pl.BlockSpec((b, c, ts), lambda si: (0, 0, si)),
                  pl.BlockSpec((b, c), lambda si: (0, 0))],         # imp stays resident
        out_specs=pl.BlockSpec((b, c, ts), lambda si: (0, 0, si)),
        compiler_params=pltpu.CompilerParams(
            dimension_semantics=("parallel",),
            vmem_limit_bytes=vmem_limit),
        cost_estimate=pl.CostEstimate(
            flops=b * hw * c, transcendentals=0,
            bytes_accessed=2 * b * hw * c * itemsize),
    )(act, imp)

    return out.reshape(b, c, h, w), l1_mean


def init_params(key, num_channels, reduction=16):
    """Synthetic parameters; Linear weights stored as (in, out)."""
    c = num_channels
    h1 = (2 * c) // reduction
    h2 = c // reduction
    ks = jax.random.split(key, 6)
    return {
        "w1": 0.1 * jax.random.normal(ks[0], (2 * c, h1), jnp.float32),
        "b1": 0.1 * jax.random.normal(ks[1], (h1,), jnp.float32),
        "w2": 0.1 * jax.random.normal(ks[2], (h1, h2), jnp.float32),
        "b2": 0.1 * jax.random.normal(ks[3], (h2,), jnp.float32),
        "w3": 0.1 * jax.random.normal(ks[4], (h2, c), jnp.float32),
        "b3": 0.1 * jax.random.normal(ks[5], (c,), jnp.float32),
    }


# ---------------------------- pure-JAX reference ----------------------------
def _ref_forward(act, prior, p):
    avg = jnp.mean(act, axis=(2, 3))                       # (B, C)
    x = jnp.concatenate([avg, prior], axis=1)              # (B, 2C)
    hh = jax.nn.relu(x @ p["w1"] + p["b1"])
    hh = jax.nn.relu(hh @ p["w2"] + p["b2"])
    att = jnp.tanh(hh @ p["w3"] + p["b3"])
    imp = jax.nn.relu(att * prior)
    out = imp[:, :, None, None] * act
    l1 = jnp.mean(jnp.sum(jnp.abs(att), axis=1))
    return out, l1


if __name__ == "__main__":
    key = jax.random.PRNGKey(0)
    k_act, k_act2, k_prior, k_param = jax.random.split(key, 4)

    # Small shapes: batch=2, channels=64 (reduction=16 -> hidden 8/4), 16x16.
    b, c, h, w, reduction = 2, 64, 16, 16, 16
    act = jax.random.normal(k_act, (b, c, h, w), jnp.float32)
    class_prior = jax.random.normal(k_prior, (b, c), jnp.float32)
    params = init_params(k_param, c, reduction)

    ref_out, ref_l1 = _ref_forward(act, class_prior, params)

    # spatial_tile=128 -> 2 spatial tiles: exercises the accumulate/finalize
    # path of the fused pool+MLP kernel and the parallel rescale grid.
    out, l1 = class_prior_forward(act, class_prior, params, spatial_tile=128)
    out = jax.block_until_ready(out)
    l1 = jax.block_until_ready(l1)
    assert out.shape == (b, c, h, w), out.shape
    assert jnp.allclose(out, ref_out, rtol=1e-4, atol=1e-4), \
        float(jnp.max(jnp.abs(out - ref_out)))
    assert jnp.allclose(l1, ref_l1, rtol=1e-4, atol=1e-4), (float(l1), float(ref_l1))

    # Default (auto) tile path.
    out_a, l1_a = class_prior_forward(act, class_prior, params)
    out_a = jax.block_until_ready(out_a)
    assert jnp.allclose(out_a, ref_out, rtol=1e-4, atol=1e-4)

    # Non-divisible spatial extent (18x18 -> H*W=324) exercises the
    # pl.cdiv grid + masked-tail path of the pool kernel.
    h2_, w2_ = 18, 18
    act2 = jax.random.normal(k_act2, (b, c, h2_, w2_), jnp.float32)
    ref_out2, ref_l12 = _ref_forward(act2, class_prior, params)
    out2, l12 = class_prior_forward(act2, class_prior, params)
    out2 = jax.block_until_ready(out2)
    l12 = jax.block_until_ready(l12)
    assert jnp.allclose(out2, ref_out2, rtol=1e-4, atol=1e-4), \
        float(jnp.max(jnp.abs(out2 - ref_out2)))
    assert jnp.allclose(l12, ref_l12, rtol=1e-4, atol=1e-4), (float(l12), float(ref_l12))

    print("KERNEL_OK")
</pallas_src>

<mosaic_0001>
module attributes {stable_mosaic.version = 11 : i64} {
  func.func @_pool_mlp_kernel(%arg0: i32, %arg1: i32, %arg2: memref<1x64x128xf32, #tpu.memory_space<vmem>>, %arg3: memref<1x1x64xf32, #tpu.memory_space<vmem>>, %arg4: memref<64x8xf32, #tpu.memory_space<vmem>>, %arg5: memref<64x8xf32, #tpu.memory_space<vmem>>, %arg6: memref<1x8xf32, #tpu.memory_space<vmem>>, %arg7: memref<8x4xf32, #tpu.memory_space<vmem>>, %arg8: memref<1x4xf32, #tpu.memory_space<vmem>>, %arg9: memref<4x64xf32, #tpu.memory_space<vmem>>, %arg10: memref<1x64xf32, #tpu.memory_space<vmem>>, %arg11: memref<1x1x64xf32, #tpu.memory_space<vmem>>, %arg12: memref<1x1x1xf32, #tpu.memory_space<vmem>>, %arg13: memref<1x64xf32, #tpu.memory_space<vmem>>) attributes {dimension_semantics = [#tpu.dimension_semantics<parallel>, #tpu.dimension_semantics<arbitrary>], iteration_bounds = array<i64: 2, 2>, scalar_prefetch = 0 : i64, scratch_operands = 1 : i64, tpu.core_type = #tpu.core_type<tc>, window_params = [{transform_indices = @transform_0, window_bounds = array<i64: 1, 64, 128>}, {transform_indices = @transform_1, window_bounds = array<i64: 1, 1, 64>}, {pipeline_mode = #tpu.pipeline_mode<synchronous>, transform_indices = @transform_2, window_bounds = array<i64: 64, 8>}, {pipeline_mode = #tpu.pipeline_mode<synchronous>, transform_indices = @transform_3, window_bounds = array<i64: 64, 8>}, {pipeline_mode = #tpu.pipeline_mode<synchronous>, transform_indices = @transform_4, window_bounds = array<i64: 1, 8>}, {pipeline_mode = #tpu.pipeline_mode<synchronous>, transform_indices = @transform_5, window_bounds = array<i64: 8, 4>}, {pipeline_mode = #tpu.pipeline_mode<synchronous>, transform_indices = @transform_6, window_bounds = array<i64: 1, 4>}, {pipeline_mode = #tpu.pipeline_mode<synchronous>, transform_indices = @transform_7, window_bounds = array<i64: 4, 64>}, {pipeline_mode = #tpu.pipeline_mode<synchronous>, transform_indices = @transform_8, window_bounds = array<i64: 1, 64>}, {transform_indices = @transform_9, window_bounds = array<i64: 1, 1, 64>}, {transform_indices = @transform_10, window_bounds = array<i64: 1, 1, 1>}]} {
    %c0_i32 = arith.constant 0 : i32
    %0 = arith.cmpi eq, %arg1, %c0_i32 : i32
    %1 = arith.extui %0 : i1 to i32
    %c0_i32_0 = arith.constant 0 : i32
    %2 = arith.cmpi ne, %1, %c0_i32_0 : i32
    scf.if %2 {
      %cst_8 = arith.constant 0.000000e+00 : f32
      %11 = vector.broadcast %cst_8 : f32 to vector<1x64xf32>
      %c0_9 = arith.constant 0 : index
      %c0_10 = arith.constant 0 : index
      %12 = vector.load %arg13[%c0_9, %c0_10] : memref<1x64xf32, #tpu.memory_space<vmem>>, vector<1x64xf32>
      tpu.vector_store %arg13[%c0_9, %c0_10], %11 {strides = array<i32>} : memref<1x64xf32, #tpu.memory_space<vmem>>, vector<1x64xf32>,
    } else {
    }
    %c0 = arith.constant 0 : index
    %c0_1 = arith.constant 0 : index
    %c0_2 = arith.constant 0 : index
    %3 = vector.load %arg2[%c0, %c0_1, %c0_2] : memref<1x64x128xf32, #tpu.memory_space<vmem>>, vector<1x64x128xf32>
    %c0_3 = arith.constant 0 : index
    %c0_4 = arith.constant 0 : index
    %4 = vector.load %arg13[%c0_3, %c0_4] : memref<1x64xf32, #tpu.memory_space<vmem>>, vector<1x64xf32>
    %cst = arith.constant dense<0.000000e+00> : vector<1x64xf32>
    %5 = vector.multi_reduction <add>, %3, %cst [2] : vector<1x64x128xf32> to vector<1x64xf32>
    %6 = arith.addf %4, %5 : vector<1x64xf32>
    %c0_5 = arith.constant 0 : index
    %c0_6 = arith.constant 0 : index
    %7 = vector.load %arg13[%c0_5, %c0_6] : memref<1x64xf32, #tpu.memory_space<vmem>>, vector<1x64xf32>
    tpu.vector_store %arg13[%c0_5, %c0_6], %6 {strides = array<i32>} : memref<1x64xf32, #tpu.memory_space<vmem>>, vector<1x64xf32>,
    %c1_i32 = arith.constant 1 : i32
    %8 = arith.cmpi eq, %arg1, %c1_i32 : i32
    %9 = arith.extui %8 : i1 to i32
    %c0_i32_7 = arith.constant 0 : i32
    %10 = arith.cmpi ne, %9, %c0_i32_7 : i32
    scf.if %10 {
      %c0_8 = arith.constant 0 : index
      %c0_9 = arith.constant 0 : index
      %11 = vector.load %arg13[%c0_8, %c0_9] : memref<1x64xf32, #tpu.memory_space<vmem>>, vector<1x64xf32>
      %cst_10 = arith.constant 3.906250e-03 : f32
      %12 = vector.broadcast %cst_10 : f32 to vector<1x64xf32>
      %13 = arith.mulf %11, %12 : vector<1x64xf32>
      %c0_11 = arith.constant 0 : index
      %c0_12 = arith.constant 0 : index
      %c0_13 = arith.constant 0 : index
      %14 = vector.load %arg3[%c0_11, %c0_12, %c0_13] : memref<1x1x64xf32, #tpu.memory_space<vmem>>, vector<1x1x64xf32>
      %15 = vector.shape_cast %14 : vector<1x1x64xf32> to vector<1x64xf32>
      %c0_14 = arith.constant 0 : index
      %c0_15 = arith.constant 0 : index
      %16 = vector.load %arg4[%c0_14, %c0_15] : memref<64x8xf32, #tpu.memory_space<vmem>>, vector<64x8xf32>
      %cst_16 = arith.constant dense<0.000000e+00> : vector<1x8xf32>
      %17 = tpu.matmul %13, %16, %cst_16 {dimension_numbers = #tpu.dot_dimension_numbers<[1], [0], [0], [1], [0, 0, 1, 1], [], []>} : vector<1x64xf32>, vector<64x8xf32>, vector<1x8xf32> -> vector<1x8xf32>
      %c0_17 = arith.constant 0 : index
      %c0_18 = arith.constant 0 : index
      %18 = vector.load %arg5[%c0_17, %c0_18] : memref<64x8xf32, #tpu.memory_space<vmem>>, vector<64x8xf32>
      %cst_19 = arith.constant dense<0.000000e+00> : vector<1x8xf32>
      %19 = tpu.matmul %15, %18, %cst_19 {dimension_numbers = #tpu.dot_dimension_numbers<[1], [0], [0], [1], [0, 0, 1, 1], [], []>} : vector<1x64xf32>, vector<64x8xf32>, vector<1x8xf32> -> vector<1x8xf32>
      %20 = arith.addf %17, %19 : vector<1x8xf32>
      %c0_20 = arith.constant 0 : index
      %c0_21 = arith.constant 0 : index
      %21 = vector.load %arg6[%c0_20, %c0_21] : memref<1x8xf32, #tpu.memory_space<vmem>>, vector<1x8xf32>
      %22 = arith.addf %20, %21 : vector<1x8xf32>
      %cst_22 = arith.constant 0.000000e+00 : f32
      %23 = vector.broadcast %cst_22 : f32 to vector<1x8xf32>
      %24 = arith.maximumf %22, %23 : vector<1x8xf32>
      %c0_23 = arith.constant 0 : index
      %c0_24 = arith.constant 0 : index
      %25 = vector.load %arg7[%c0_23, %c0_24] : memref<8x4xf32, #tpu.memory_space<vmem>>, vector<8x4xf32>
      %cst_25 = arith.constant dense<0.000000e+00> : vector<1x4xf32>
      %26 = tpu.matmul %24, %25, %cst_25 {dimension_numbers = #tpu.dot_dimension_numbers<[1], [0], [0], [1], [0, 0, 1, 1], [], []>} : vector<1x8xf32>, vector<8x4xf32>, vector<1x4xf32> -> vector<1x4xf32>
      %c0_26 = arith.constant 0 : index
      %c0_27 = arith.constant 0 : index
      %27 = vector.load %arg8[%c0_26, %c0_27] : memref<1x4xf32, #tpu.memory_space<vmem>>, vector<1x4xf32>
      %28 = arith.addf %26, %27 : vector<1x4xf32>
      %cst_28 = arith.constant 0.000000e+00 : f32
      %29 = vector.broadcast %cst_28 : f32 to vector<1x4xf32>
      %30 = arith.maximumf %28, %29 : vector<1x4xf32>
      %c0_29 = arith.constant 0 : index
      %c0_30 = arith.constant 0 : index
      %31 = vector.load %arg9[%c0_29, %c0_30] : memref<4x64xf32, #tpu.memory_space<vmem>>, vector<4x64xf32>
      %cst_31 = arith.constant dense<0.000000e+00> : vector<1x64xf32>
      %32 = tpu.matmul %30, %31, %cst_31 {dimension_numbers = #tpu.dot_dimension_numbers<[1], [0], [0], [1], [0, 0, 1, 1], [], []>} : vector<1x4xf32>, vector<4x64xf32>, vector<1x64xf32> -> vector<1x64xf32>
      %c0_32 = arith.constant 0 : index
      %c0_33 = arith.constant 0 : index
      %33 = vector.load %arg10[%c0_32, %c0_33] : memref<1x64xf32, #tpu.memory_space<vmem>>, vector<1x64xf32>
      %34 = arith.addf %32, %33 : vector<1x64xf32>
      %35 = math.tanh %34 : vector<1x64xf32>
      %36 = arith.mulf %35, %15 : vector<1x64xf32>
      %cst_34 = arith.constant 0.000000e+00 : f32
      %37 = vector.broadcast %cst_34 : f32 to vector<1x64xf32>
      %38 = arith.maximumf %36, %37 : vector<1x64xf32>
      %c0_35 = arith.constant 0 : index
      %c0_36 = arith.constant 0 : index
      %c0_37 = arith.constant 0 : index
      %39 = vector.load %arg11[%c0_35, %c0_36, %c0_37] : memref<1x1x64xf32, #tpu.memory_space<vmem>>, vector<1x1x64xf32>
      %40 = vector.shape_cast %39 : vector<1x1x64xf32> to vector<1x64xf32>
      %41 = vector.shape_cast %38 : vector<1x64xf32> to vector<1x1x64xf32>
      tpu.vector_store %arg11[%c0_35, %c0_36, %c0_37], %41 {strides = array<i32>} : memref<1x1x64xf32, #tpu.memory_space<vmem>>, vector<1x1x64xf32>,
      %42 = math.absf %35 : vector<1x64xf32>
      %cst_38 = arith.constant dense<0.000000e+00> : vector<1xf32>
      %43 = vector.multi_reduction <add>, %42, %cst_38 [1] : vector<1x64xf32> to vector<1xf32>
      %44 = vector.shape_cast %43 : vector<1xf32> to vector<1x1xf32>
      %c0_39 = arith.constant 0 : index
      %c0_40 = arith.constant 0 : index
      %c0_41 = arith.constant 0 : index
      %45 = vector.load %arg12[%c0_39, %c0_40, %c0_41] : memref<1x1x1xf32, #tpu.memory_space<vmem>>, vector<1x1x1xf32>
      %46 = vector.shape_cast %45 : vector<1x1x1xf32> to vector<1x1xf32>
      %47 = vector.shape_cast %44 : vector<1x1xf32> to vector<1x1x1xf32>
      tpu.vector_store %arg12[%c0_39, %c0_40, %c0_41], %47 {strides = array<i32>} : memref<1x1x1xf32, #tpu.memory_space<vmem>>, vector<1x1x1xf32>,
    } else {
    }
    return
  }
  func.func @transform_0(%arg0: i32, %arg1: i32) -> (i32, i32, i32) {
    %c0_i32 = arith.constant 0 : i32
    %c0_i32_0 = arith.constant 0 : i32
    return %arg0, %c0_i32, %arg1 : i32, i32, i32
  }
  func.func @transform_1(%arg0: i32, %arg1: i32) -> (i32, i32, i32) {
    %c0_i32 = arith.constant 0 : i32
    %c0_i32_0 = arith.constant 0 : i32
    %c0_i32_1 = arith.constant 0 : i32
    return %arg0, %c0_i32, %c0_i32_0 : i32, i32, i32
  }
  func.func @transform_2(%arg0: i32, %arg1: i32) -> (i32, i32) {
    %c0_i32 = arith.constant 0 : i32
    %c0_i32_0 = arith.constant 0 : i32
    %c0_i32_1 = arith.constant 0 : i32
    return %c0_i32, %c0_i32_0 : i32, i32
  }
  func.func @transform_3(%arg0: i32, %arg1: i32) -> (i32, i32) {
    %c0_i32 = arith.constant 0 : i32
    %c0_i32_0 = arith.constant 0 : i32
    %c0_i32_1 = arith.constant 0 : i32
    return %c0_i32, %c0_i32_0 : i32, i32
  }
  func.func @transform_4(%arg0: i32, %arg1: i32) -> (i32, i32) {
    %c0_i32 = arith.constant 0 : i32
    %c0_i32_0 = arith.constant 0 : i32
    %c0_i32_1 = arith.constant 0 : i32
    return %c0_i32, %c0_i32_0 : i32, i32
  }
  func.func @transform_5(%arg0: i32, %arg1: i32) -> (i32, i32) {
    %c0_i32 = arith.constant 0 : i32
    %c0_i32_0 = arith.constant 0 : i32
    %c0_i32_1 = arith.constant 0 : i32
    return %c0_i32, %c0_i32_0 : i32, i32
  }
  func.func @transform_6(%arg0: i32, %arg1: i32) -> (i32, i32) {
    %c0_i32 = arith.constant 0 : i32
    %c0_i32_0 = arith.constant 0 : i32
    %c0_i32_1 = arith.constant 0 : i32
    return %c0_i32, %c0_i32_0 : i32, i32
  }
  func.func @transform_7(%arg0: i32, %arg1: i32) -> (i32, i32) {
    %c0_i32 = arith.constant 0 : i32
    %c0_i32_0 = arith.constant 0 : i32
    %c0_i32_1 = arith.constant 0 : i32
    return %c0_i32, %c0_i32_0 : i32, i32
  }
  func.func @transform_8(%arg0: i32, %arg1: i32) -> (i32, i32) {
    %c0_i32 = arith.constant 0 : i32
    %c0_i32_0 = arith.constant 0 : i32
    %c0_i32_1 = arith.constant 0 : i32
    return %c0_i32, %c0_i32_0 : i32, i32
  }
  func.func @transform_9(%arg0: i32, %arg1: i32) -> (i32, i32, i32) {
    %c0_i32 = arith.constant 0 : i32
    %c0_i32_0 = arith.constant 0 : i32
    %c0_i32_1 = arith.constant 0 : i32
    return %arg0, %c0_i32, %c0_i32_0 : i32, i32, i32
  }
  func.func @transform_10(%arg0: i32, %arg1: i32) -> (i32, i32, i32) {
    %c0_i32 = arith.constant 0 : i32
    %c0_i32_0 = arith.constant 0 : i32
    %c0_i32_1 = arith.constant 0 : i32
    return %arg0, %c0_i32, %c0_i32_0 : i32, i32, i32
  }
}

</mosaic_0001>

<bundles_post_ra>
// kernel: tpu_custom_call.1
= control target key start
LH: loop header
LB: loop body
LE: loop exit
PB: predicated region body
PF: predicated region fallthrough
CT: control target
= control target key end

     0   :  { %s1532_s0 = inlined_call_operand.hbm [shape: f32[2,64,256], index: 0, kind: input, shape index: {}]   ;;  %s1533_s1 = inlined_call_operand.vmem [shape: f32[2,1,64], index: 1, kind: input, shape index: {}]   ;;  %s1534_s2 = inlined_call_operand.vmem [shape: f32[64,8], index: 2, kind: input, shape index: {}]   ;;  %s1535_s3 = inlined_call_operand.vmem [shape: f32[64,8], index: 3, kind: input, shape index: {}]   ;;  %s1536_s4 = inlined_call_operand.vmem [shape: f32[1,8], index: 4, kind: input, shape index: {}]   ;;  %s1537_s5 = inlined_call_operand.vmem [shape: f32[8,4], index: 5, kind: input, shape index: {}]   ;;  %s1538_s6 = inlined_call_operand.vmem [shape: f32[1,4], index: 6, kind: input, shape index: {}]   ;;  %s1539_s7 = inlined_call_operand.vmem [shape: f32[4,64], index: 7, kind: input, shape index: {}]   ;;  %s1540_s8 = inlined_call_operand.vmem [shape: f32[1,64], index: 8, kind: input, shape index: {}]   ;;  %s1541_s9 = inlined_call_operand.hbm [shape: f32[2,1,64], index: 9, kind: output, shape index: {0}]   ;;  %s1542_s10 = inlined_call_operand.vmem [shape: f32[2,1,1], index: 10, kind: output, shape index: {1}]  }
   0x1   :  { %1551 = sst [smem:[#allocation17_spill]] %s1536_s4 }
   0x2   :  { %1552 = sst [smem:[#allocation18_spill]] %s1538_s6 }
   0x3   :  { %1553 = sst [smem:[#allocation19_spill]] %s1539_s7 }
   0x4   :  { %1554 = sst [smem:[#allocation20_spill]] %s1540_s8 }
   0x5   :  { %1555 = sst [smem:[#allocation21_spill]] %s1541_s9 }
   0x6   :  { %16 = vsyncpa [#allocation4], 0 }
   0x7   :  { %18 = vsyncpa [#allocation4 + $0x1], 0 }
   0x8   :  { %19 = vsyncpa [#allocation5], 0 }
   0x9   :  { %21 = vsyncpa [#allocation5 + $0x1], 0  ;;  %s1268_s13 = smov 0   ;;  %s1270_s14 = smov 0  }
   0xa   :  { %s1272_s15 = smov 0   ;;  %s1274_s16 = smov 0  }
   0xb   :  { %s1276_s17 = smov 0   ;;  %s1278_s18 = smov 0  }
   0xc   :  { %s1280_s19 = smov 0   ;;  %s1282_s20 = smov 0  }
   0xd   :  { %s1284_s21 = smov 0   ;;  %s1286_s22 = smov 0  }
   0xe   :  { %s1288_s23 = smov 0  }
   0xf LB: > { %1556 = sst [smem:[#allocation9_spill]] %s1174_s15  ;;  %s924_s24 = sadd.s32 4294967295, %s1206_s23   ;;  %s1206_s23 = sphi %s1288_s23, %s27_s23   ;;  %s1202_s22 = sphi %s1286_s22, %s1588_s22   ;;  %s1198_s21 = sphi %s1284_s21, %s1587_s21   ;;  %s1194_s20 = sphi %s1282_s20, %s1586_s20   ;;  %s1190_s19 = sphi %s1280_s19, %s1585_s19   ;;  %s1186_s18 = sphi %s1278_s18, %s1578_s18   ;;  %s1182_s17 = sphi %s1276_s17, %s1584_s17   ;;  %s1178_s16 = sphi %s1274_s16, %s1583_s16   ;;  %s1174_s15 = sphi %s1272_s15, %s1576_s15   ;;  %s1170_s14 = sphi %s1270_s14, %s1582_s14   ;;  %s1166_s13 = sphi %s1268_s13, %s1581_s13  }
  0x10   : > { %1557 = sst [smem:[#allocation10_spill]] %s1186_s18  ;;  %s925_s25 = sadd.s32 4294967294, %s1206_s23  }
  0x11   : > { %s36_s26 = sadd.s32 1, %s1198_s21  ;;  %s39_s27 = sadd.s32 1, %s1202_s22 }
  0x12   : > { %p37_p0 = scmp.ge.s32.totalorder %s36_s26, 2  ;;  %s48_s28 = sadd.s32 1, %s1186_s18 }
  0x13   : > { %p55_p1 = scmp.ne.s32.totalorder %s1186_s18, %s1182_s17  ;;  %p56_p2 = scmp.eq.s32.totalorder %s1206_s23, 0 }
  0x14   : > { %s1590_s26 = smov (%p37_p0, %s36_s26), 0  ;;  %s1592_s27 = smov (!%p37_p0, %s39_s27), %s1202_s22 }
  0x15   : > { %1558 = sst [smem:[#allocation11_spill]] %s1590_s26  ;;  %s44_s29 = ssub.s32 %s1198_s21, %s1590_s26 }
  0x16   : > { %p1334_p3 = por %p56_p2, %p55_p1  ;;  %p41_p4 = scmp.ge.s32.totalorder %s1592_s27, 2 }
  0x17   : > { %p61_p5 = scmp.ne.s32.totalorder %s1182_s17, %s1178_s16  ;;  %p62_p6 = scmp.eq.s32.totalorder %s924_s24, 0 }
  0x18   : > { %s247_s11 = sadd.s32 1, %s1174_s15  ;;  %s1594_s27 = smov (%p41_p4, %s1592_s27), 0 }
  0x19   : > { %1560 = sst [smem:[#allocation12_spill]] %s1594_s27  ;;  %p1342_p7 = por %p62_p6, %p61_p5 }
  0x1a   : > { %p257_p8 = scmp.ne.s32.totalorder %s1174_s15, %s1170_s14  ;;  %s43_s26 = ssub.s32 %s1202_s22, %s1594_s27 }
  0x1b   : > { %p258_p9 = scmp.eq.s32.totalorder %s924_s24, 3  ;;  %s45_s9 = sor.u32 %s44_s29, %s43_s26 }
  0x1c   : > { %p245_p10 = scmp.eq.s32.totalorder %s43_s26, 0  ;;  %p46_p11 = scmp.eq.s32.totalorder %s45_s9, 0 }
  0x1d   : > { %p1350_p12 = por %p258_p9, %p257_p8  ;;  %p263_p13 = scmp.ne.s32.totalorder %s1170_s14, %s1166_s13 }
  0x1e   : > { %s1355_s8 = scalar_select %p245_p10, %s1174_s15, %s247_s11  }
  0x1f   : > { %s1562_s16 = scalar_select %p1350_p12, 1, 0 }
  0x20   : > { %1564 = sst [smem:[#allocation14_spill]] %s1355_s8  ;;  %p264_p0 = scmp.eq.s32.totalorder %s925_s25, 3 }
  0x21   : > { %1563 = sst [smem:[#allocation13_spill]] %s1562_s16  ;;  %p954_p1 = scmp.lt.s32.totalorder %s1206_s23, 4 }
  0x22   : > { %s1358_s6 = scalar_select %p46_p11, %s1186_s18, %s48_s28  }
  0x23   : > { %p1363_p2 = por %p264_p0, %p263_p13  ;;  %s331_s24 = sand.u32 1, %s1186_s18  }
  0x24   : > { %1565 = sst [smem:[#allocation15_spill]] %s1358_s6  ;;  %s928_s29 = sshll.u32 %s331_s24, 6 }
  0x25   : > { %s1566_s7 = scalar_select %p1363_p2, 1, 0 }
  0x26   : > { %s929_s9 = sshll.u32 %s1202_s22, 4  ;;  %s335_s27 = scalar_lea.vmem [#allocation3], %s928_s29 }
  0x27   : > { %1567 = sst [smem:[#allocation16_spill]] %s1566_s7  ;;  %s339_s26 = sadd.s32 %s1198_s21, %s929_s9 }
  0x28   : > { %s344_s16 = sshll.u32 %s335_s27, 4  ;;  %s930_s4 = sshll.u32 %s339_s26, 3  ;;  %s345_s16 = int_to_ptr.vmem [resolvable:$true] %s344_s16 }
  0x29   : > { %s341_s6 = scalar_lea.hbm %s1532_s0, %s930_s4  ;;  %p947_p4 = pnand %p954_p1, %p1334_p3 }
  0x2a   : > { %s342_s25 = sshll.u32 %s341_s6, 4  ;;  %s332_s8 = scalar_lea.sflag [#allocation4], %s331_s24  ;;  %s343_s25 = int_to_ptr.hbm [resolvable:$true] %s342_s25 }
  0x2b   : > { %s1208_s15 = smov 256   ;;  %s1209_s18 = smov 128  }
  0x2c   : > { %s1210_s7 = smov 8   ;;  %p931_p5 = scmp.ge.s32.totalorder %s1206_s23, 1 }
  0x2d   : > { %949 = dma.hbm_to_vmem [thread:$0]  (!%p947_p4), %s343_s25, 1024, %s345_s16, %s332_s8, %s1208_s15, %s1209_s18, %s1210_s7  }
  0x2e   : > { %p358_p6 = scmp.lt.s32.totalorder %s1206_s23, 5 }
  0x30   : > { %p359_p8 = pnand %p931_p5, %p358_p6 }
  0x31   : > { %s364_s27 = sand.u32 (!%p359_p8), 1, %s1182_s17  }
  0x32   : > { %362 = sbr.rel (%p359_p8) target bundleno = 992 (0x3e0), region = 56  ;;  %s932_s29 = sshll.u32 (!%p359_p8), %s364_s27, 6 }
  0x33   : > { %s365_s9 = scalar_lea.sflag (!%p359_p8), [#allocation4], %s364_s27  ;;  %s368_s26 = scalar_lea.vmem (!%p359_p8), [#allocation3], %s932_s29 }
  0x37   : > { %1157 = dma.done.wait (%p1342_p7), %s365_s9, 1024  }
  0x38   : > { %1159 = vsyncadd (%p1342_p7), %s365_s9, 4294966272  ;;  %s404_s4 = sand.u32 1, %s1170_s14   ;;  %p411_p3 = scmp.lt.s32.totalorder %s1194_s20, 1 }
  0x39   : > { %s1397_s12 = scalar_lea.vmem [#allocation6], %s404_s4  ;;  %p933_p7 = scmp.ne.s32.totalorder %s1190_s19, 0 }
  0x3a   : > { %s1385_s6 = scalar_select %p411_p3, %s1194_s20, 1 }
  0x3b   : > { %420 = sbr.rel (%p933_p7) target bundleno = 66 (0x42), region = 64 }
  0x3c   : > { %s413_s15 = scalar_lea.vmem %s1533_s1, %s1385_s6  ;;  %s416_s16 = scalar_lea.vmem %s1542_s10, %s1385_s6 }
  0x40   : > { %vm421_vm0 = vcmask 516096   ;;  %v1211_v0 = vmov 0.0  }
  0x41   : > { %422 = vst.msk [vmem:[#allocation2] sm:$0x1] %vm421_vm0, %v1211_v0 }
  0x42 PF: > { %v423_v1 = vld [vmem:[%s368_s26] sm:$0xff]  ;;  %v425_v2 = vld [vmem:[%s368_s26 + $0x10] sm:$0xff]  ;;  %v424_v4 = vld [vmem:[%s368_s26 + $0x8] sm:$0xff]  ;;  %v1212_v9 = vmov 0   ;;  %vm628_vm1 = vcmask 130112   ;;  %vm632_vm2 = vcmask 195712  }
  0x43   : > { %432 = vadd.xlane.f32.xlu0 %v423_v1  ;;  %436 = vadd.xlane.f32.xlu1 %v425_v2  ;;  %v427_v3 = vld [vmem:[%s368_s26 + $0x20] sm:$0xff]  ;;  %v426_v5 = vld [vmem:[%s368_s26 + $0x18] sm:$0xff]  ;;  %v428_v6 = vld [vmem:[%s368_s26 + $0x28] sm:$0xff]  ;;  %vm636_vm3 = vcmask 261312   ;;  %vm640_vm4 = vcmask 326912   ;;  %vm644_vm5 = vcmask 392512  }
  0x44   : > { %440 = vadd.xlane.f32.xlu2 %v427_v3  ;;  %v429_v7 = vld [vmem:[%s368_s26 + $0x30] sm:$0xff]  ;;  %v430_v8 = vld [vmem:[%s368_s26 + $0x38] sm:$0xff]  ;;  %1050 = vset.pattern.permute.xlu0 %v1212_v9  ;;  %vm648_vm6 = vcmask 458112   ;;  %vm652_vm7 = vcmask 523712   ;;  %vm656_vm8 = vcmask 516096   ;;  %p934_p9 = scmp.ne.s32.totalorder %s1190_s19, 1 }
  0x45   : > { %1049 = vset.pattern.permute.xlu2 %v1212_v9  ;;  %1051 = vset.pattern.permute.xlu1 %v1212_v9  ;;  %s1568_s30 = sld [smem:[#allocation17_spill]] (!%p934_p9) }
  0x46   : > { %s1569_s11 = sld [smem:[#allocation19_spill]] (!%p934_p9) }
  0x47   : > { %s1570_s27 = sld [smem:[#allocation18_spill]] (!%p934_p9) }
  0x48   : > { %s1571_s26 = sld [smem:[#allocation20_spill]] (!%p934_p9) }
  0x4b   : > { %434 = vadd.xlane.f32.xlu0 %v424_v4  ;;  %438 = vadd.xlane.f32.xlu1 %v426_v5 }
  0x4c   : > { %442 = vadd.xlane.f32.xlu2 %v428_v6 }
  0x53   : > { %444 = vadd.xlane.f32.xlu0 %v429_v7  ;;  %446 = vadd.xlane.f32.xlu1 %v430_v8 }
  0xb6   : > { %v433_v10 = vpop.xlane.xlu0 %432  ;;  %v437_v29 = vpop.xlane.xlu1 %436 }
  0xb7   : > { %v456_v11 = vperm.slane %v433_v10, 0  ;;  %v457_v12 = vperm.slane %v433_v10, 1  ;;  %v458_v13 = vperm.slane %v433_v10, 2  ;;  %v459_v14 = vperm.slane %v433_v10, 3  ;;  %v441_v49 = vpop.xlane.xlu2 %440 }
  0xb8   : > { %v460_v15 = vperm.slane %v433_v10, 4  ;;  %v461_v16 = vperm.slane %v433_v10, 5  ;;  %v462_v17 = vperm.slane %v433_v10, 6  ;;  %v463_v18 = vperm.slane %v433_v10, 7 }
  0xb9   : > { %520 = vst [vmem:[#allocation1] ss:$9 sm:$0xff] %v456_v11  ;;  %v472_v30 = vperm.slane %v437_v29, 0  ;;  %v473_v31 = vperm.slane %v437_v29, 1  ;;  %v474_v32 = vperm.slane %v437_v29, 2  ;;  %v475_v34 = vperm.slane %v437_v29, 3 }
  0xba   : > { %522 = vst [vmem:[#allocation1 + $0x1] ss:$9 sm:$0xff] %v457_v12  ;;  %v476_v35 = vperm.slane %v437_v29, 4  ;;  %v477_v36 = vperm.slane %v437_v29, 5  ;;  %v478_v37 = vperm.slane %v437_v29, 6  ;;  %v479_v38 = vperm.slane %v437_v29, 7 }
  0xbb   : > { %524 = vst [vmem:[#allocation1 + $0x2] ss:$9 sm:$0xff] %v458_v13  ;;  %v488_v50 = vperm.slane %v441_v49, 0  ;;  %v489_v51 = vperm.slane %v441_v49, 1  ;;  %v490_v52 = vperm.slane %v441_v49, 2  ;;  %v491_v54 = vperm.slane %v441_v49, 3 }
  0xbc   : > { %526 = vst [vmem:[#allocation1 + $0x3] ss:$9 sm:$0xff] %v459_v14  ;;  %v492_v55 = vperm.slane %v441_v49, 4  ;;  %v493_v56 = vperm.slane %v441_v49, 5  ;;  %v494_v57 = vperm.slane %v441_v49, 6  ;;  %v495_v58 = vperm.slane %v441_v49, 7 }
  0xbd   : > { %528 = vst [vmem:[#allocation1 + $0x4] ss:$9 sm:$0xff] %v460_v15 }
  0xbe   : > { %530 = vst [vmem:[#allocation1 + $0x5] ss:$9 sm:$0xff] %v461_v16  ;;  %v435_v19 = vpop.xlane.xlu0 %434  ;;  %v439_v39 = vpop.xlane.xlu1 %438 }
  0xbf   : > { %532 = vst [vmem:[#allocation1 + $0x6] ss:$9 sm:$0xff] %v462_v17  ;;  %v464_v20 = vperm.slane %v435_v19, 0  ;;  %v465_v21 = vperm.slane %v435_v19, 1  ;;  %v466_v22 = vperm.slane %v435_v19, 2  ;;  %v467_v24 = vperm.slane %v435_v19, 3  ;;  %v443_v59 = vpop.xlane.xlu2 %442 }
  0xc0   : > { %534 = vst [vmem:[#allocation1 + $0x7] ss:$9 sm:$0xff] %v463_v18  ;;  %v468_v25 = vperm.slane %v435_v19, 4  ;;  %v469_v26 = vperm.slane %v435_v19, 5  ;;  %v470_v27 = vperm.slane %v435_v19, 6  ;;  %v471_v28 = vperm.slane %v435_v19, 7 }
  0xc1   : > { %v480_v40 = vperm.slane %v439_v39, 0  ;;  %v481_v41 = vperm.slane %v439_v39, 1  ;;  %v482_v42 = vperm.slane %v439_v39, 2  ;;  %v483_v44 = vperm.slane %v439_v39, 3 }
  0xc2   : > { %v484_v45 = vperm.slane %v439_v39, 4  ;;  %v485_v46 = vperm.slane %v439_v39, 5  ;;  %v486_v47 = vperm.slane %v439_v39, 6  ;;  %v487_v48 = vperm.slane %v439_v39, 7 }
  0xc3   : > { %v496_v60 = vperm.slane %v443_v59, 0  ;;  %v497_v61 = vperm.slane %v443_v59, 1  ;;  %v498_v62 = vperm.slane %v443_v59, 2  ;;  %v499_v0 = vperm.slane %v443_v59, 3 }
  0xc4   : > { %v500_v1 = vperm.slane %v443_v59, 4  ;;  %v501_v2 = vperm.slane %v443_v59, 5  ;;  %v502_v3 = vperm.slane %v443_v59, 6  ;;  %v503_v4 = vperm.slane %v443_v59, 7 }
  0xc6   : > { %v445_v5 = vpop.xlane.xlu0 %444  ;;  %v447_v15 = vpop.xlane.xlu1 %446 }
  0xc7   : > { %v535_v23 = vld [vmem:[#allocation1] sm:$0xff]  ;;  %v504_v6 = vperm.slane %v445_v5, 0  ;;  %v505_v7 = vperm.slane %v445_v5, 1  ;;  %v506_v8 = vperm.slane %v445_v5, 2  ;;  %v507_v9 = vperm.slane %v445_v5, 3 }
  0xc8   : > { %536 = vst [vmem:[#allocation1] ss:$9 sm:$0xff] %v464_v20  ;;  %600 = vperm.xlu2 %1049, %v535_v23   ;;  %v508_v11 = vperm.slane %v445_v5, 4  ;;  %v509_v12 = vperm.slane %v445_v5, 5  ;;  %v510_v13 = vperm.slane %v445_v5, 6  ;;  %v511_v14 = vperm.slane %v445_v5, 7 }
  0xc9   : > { %537 = vst [vmem:[#allocation1 + $0x1] ss:$9 sm:$0xff] %v465_v21  ;;  %v512_v16 = vperm.slane %v447_v15, 0  ;;  %v513_v17 = vperm.slane %v447_v15, 1  ;;  %v514_v18 = vperm.slane %v447_v15, 2  ;;  %v515_v19 = vperm.slane %v447_v15, 3 }
  0xca   : > { %538 = vst [vmem:[#allocation1 + $0x2] ss:$9 sm:$0xff] %v466_v22  ;;  %v516_v21 = vperm.slane %v447_v15, 4  ;;  %v517_v22 = vperm.slane %v447_v15, 5  ;;  %v518_v23 = vperm.slane %v447_v15, 6 }
  0xcb   : > { %539 = vst [vmem:[#allocation1 + $0x3] ss:$9 sm:$0xff] %v467_v24  ;;  %v519_v24 = vperm.slane %v447_v15, 7 }
  0xcc   : > { %540 = vst [vmem:[#allocation1 + $0x4] ss:$9 sm:$0xff] %v468_v25 }
  0xcd   : > { %541 = vst [vmem:[#allocation1 + $0x5] ss:$9 sm:$0xff] %v469_v26 }
  0xce   : > { %542 = vst [vmem:[#allocation1 + $0x6] ss:$9 sm:$0xff] %v470_v27  ;;  %v623_v27 = vlaneseq }
  0xcf   : > { %543 = vst [vmem:[#allocation1 + $0x7] ss:$9 sm:$0xff] %v471_v28 }
  0xd0   : > { %v624_v29 = vand.u32 127, %v623_v27 }
  0xd6   : > { %v544_v33 = vld [vmem:[#allocation1] sm:$0xff] }
  0xd7   : > { %545 = vst [vmem:[#allocation1] ss:$9 sm:$0xff] %v472_v30  ;;  %603 = vperm.xlu0 %1050, %v544_v33   ;;  %v626_v30 = vadd.s32 4294967288, %v624_v29 }
  0xd8   : > { %546 = vst [vmem:[#allocation1 + $0x1] ss:$9 sm:$0xff] %v473_v31 }
  0xd9   : > { %547 = vst [vmem:[#allocation1 + $0x2] ss:$9 sm:$0xff] %v474_v32  ;;  %v630_v32 = vadd.s32 4294967280, %v624_v29 }
  0xda   : > { %548 = vst [vmem:[#allocation1 + $0x3] ss:$9 sm:$0xff] %v475_v34 }
  0xdb   : > { %549 = vst [vmem:[#allocation1 + $0x4] ss:$9 sm:$0xff] %v476_v35 }
  0xdc   : > { %550 = vst [vmem:[#allocation1 + $0x5] ss:$9 sm:$0xff] %v477_v36 }
  0xdd   : > { %551 = vst [vmem:[#allocation1 + $0x6] ss:$9 sm:$0xff] %v478_v37  ;;  %v634_v37 = vadd.s32 4294967272, %v624_v29 }
  0xde   : > { %552 = vst [vmem:[#allocation1 + $0x7] ss:$9 sm:$0xff] %v479_v38 }
  0xe5   : > { %v553_v43 = vld [vmem:[#allocation1] sm:$0xff] }
  0xe6   : > { %554 = vst [vmem:[#allocation1] ss:$9 sm:$0xff] %v480_v40  ;;  %606 = vperm.xlu1 %1051, %v553_v43   ;;  %v642_v40 = vadd.s32 4294967256, %v624_v29 }
  0xe7   : > { %555 = vst [vmem:[#allocation1 + $0x1] ss:$9 sm:$0xff] %v481_v41  ;;  %v638_v41 = vadd.s32 4294967264, %v624_v29 }
  0xe8   : > { %556 = vst [vmem:[#allocation1 + $0x2] ss:$9 sm:$0xff] %v482_v42 }
  0xe9   : > { %557 = vst [vmem:[#allocation1 + $0x3] ss:$9 sm:$0xff] %v483_v44 }
  0xea   : > { %558 = vst [vmem:[#allocation1 + $0x4] ss:$9 sm:$0xff] %v484_v45 }
  0xeb   : > { %559 = vst [vmem:[#allocation1 + $0x5] ss:$9 sm:$0xff] %v485_v46 }
  0xec   : > { %560 = vst [vmem:[#allocation1 + $0x6] ss:$9 sm:$0xff] %v486_v47 }
  0xed   : > { %561 = vst [vmem:[#allocation1 + $0x7] ss:$9 sm:$0xff] %v487_v48  ;;  %v646_v48 = vadd.s32 4294967248, %v624_v29 }
  0xf4   : > { %v562_v53 = vld [vmem:[#allocation1] sm:$0xff] }
  0xf5   : > { %563 = vst [vmem:[#allocation1] ss:$9 sm:$0xff] %v488_v50  ;;  %609 = vperm.xlu2 %1049, %v562_v53   ;;  %v650_v50 = vadd.s32 4294967240, %v624_v29 }
  0xf6   : > { %564 = vst [vmem:[#allocation1 + $0x1] ss:$9 sm:$0xff] %v489_v51 }
  0xf7   : > { %565 = vst [vmem:[#allocation1 + $0x2] ss:$9 sm:$0xff] %v490_v52 }
  0xf8   : > { %566 = vst [vmem:[#allocation1 + $0x3] ss:$9 sm:$0xff] %v491_v54 }
  0xf9   : > { %567 = vst [vmem:[#allocation1 + $0x4] ss:$9 sm:$0xff] %v492_v55  ;;  %v431_v55 = vld [vmem:[#allocation2] sm:$0x1] }
  0xfa   : > { %568 = vst [vmem:[#allocation1 + $0x5] ss:$9 sm:$0xff] %v493_v56 }
  0xfb   : > { %569 = vst [vmem:[#allocation1 + $0x6] ss:$9 sm:$0xff] %v494_v57 }
  0xfc   : > { %570 = vst [vmem:[#allocation1 + $0x7] ss:$9 sm:$0xff] %v495_v58 }
 0x103   : > { %v571_v63 = vld [vmem:[#allocation1] sm:$0xff] }
 0x104   : > { %572 = vst [vmem:[#allocation1] ss:$9 sm:$0xff] %v496_v60  ;;  %612 = vperm.xlu2 %1049, %v571_v63  }
 0x105   : > { %573 = vst [vmem:[#allocation1 + $0x1] ss:$9 sm:$0xff] %v497_v61 }
 0x106   : > { %574 = vst [vmem:[#allocation1 + $0x2] ss:$9 sm:$0xff] %v498_v62 }
 0x107   : > { %575 = vst [vmem:[#allocation1 + $0x3] ss:$9 sm:$0xff] %v499_v0 }
 0x108   : > { %576 = vst [vmem:[#allocation1 + $0x4] ss:$9 sm:$0xff] %v500_v1 }
 0x109   : > { %577 = vst [vmem:[#allocation1 + $0x5] ss:$9 sm:$0xff] %v501_v2 }
 0x10a   : > { %578 = vst [vmem:[#allocation1 + $0x6] ss:$9 sm:$0xff] %v502_v3 }
 0x10b   : > { %579 = vst [vmem:[#allocation1 + $0x7] ss:$9 sm:$0xff] %v503_v4 }
 0x112   : > { %v580_v10 = vld [vmem:[#allocation1] sm:$0xff] }
 0x113   : > { %615 = vperm.xlu1 %1051, %v580_v10   ;;  %581 = vst [vmem:[#allocation1] ss:$9 sm:$0xff] %v504_v6 }
 0x114   : > { %582 = vst [vmem:[#allocation1 + $0x1] ss:$9 sm:$0xff] %v505_v7 }
 0x115   : > { %583 = vst [vmem:[#allocation1 + $0x2] ss:$9 sm:$0xff] %v506_v8 }
 0x116   : > { %584 = vst [vmem:[#allocation1 + $0x3] ss:$9 sm:$0xff] %v507_v9 }
 0x117   : > { %585 = vst [vmem:[#allocation1 + $0x4] ss:$9 sm:$0xff] %v508_v11 }
 0x118   : > { %586 = vst [vmem:[#allocation1 + $0x5] ss:$9 sm:$0xff] %v509_v12 }
 0x119   : > { %587 = vst [vmem:[#allocation1 + $0x6] ss:$9 sm:$0xff] %v510_v13 }
 0x11a   : > { %588 = vst [vmem:[#allocation1 + $0x7] ss:$9 sm:$0xff] %v511_v14 }
 0x121   : > { %v589_v20 = vld [vmem:[#allocation1] sm:$0xff] }
 0x122   : > { %618 = vperm.xlu2 %1049, %v589_v20   ;;  %590 = vst [vmem:[#allocation1] ss:$9 sm:$0xff] %v512_v16  ;;  %v601_v26 = vpop.permute.xlu2 %600 }
 0x123   : > { %591 = vst [vmem:[#allocation1 + $0x1] ss:$9 sm:$0xff] %v513_v17  ;;  %v625_v36 = vperm.slane %v601_v26, %v624_v29 }
 0x124   : > { %592 = vst [vmem:[#allocation1 + $0x2] ss:$9 sm:$0xff] %v514_v18 }
 0x125   : > { %593 = vst [vmem:[#allocation1 + $0x3] ss:$9 sm:$0xff] %v515_v19 }
 0x126   : > { %594 = vst [vmem:[#allocation1 + $0x4] ss:$9 sm:$0xff] %v516_v21 }
 0x127   : > { %595 = vst [vmem:[#allocation1 + $0x5] ss:$9 sm:$0xff] %v517_v22 }
 0x128   : > { %596 = vst [vmem:[#allocation1 + $0x6] ss:$9 sm:$0xff] %v518_v23 }
 0x129   : > { %597 = vst [vmem:[#allocation1 + $0x7] ss:$9 sm:$0xff] %v519_v24 }
 0x130   : > { %v598_v25 = vld [vmem:[#allocation1] sm:$0xff] }
 0x131   : > { %621 = vperm.xlu1 %1051, %v598_v25  }
 0x149   : > { %v604_v31 = vpop.permute.xlu0 %603 }
 0x14a   : > { %v627_v34 = vperm.slane %v604_v31, %v626_v30 }
 0x14c   : > { %v629_v39 = vsel %vm628_vm1, %v627_v34, %v625_v36 }
 0x14f   : > { %v610_v28 = vpop.permute.xlu2 %609 }
 0x150   : > { %v635_v44 = vperm.slane %v610_v28, %v634_v37 }
 0x158   : > { %v607_v33 = vpop.permute.xlu1 %606 }
 0x159   : > { %v631_v35 = vperm.slane %v607_v33, %v630_v32 }
 0x15b   : > { %v633_v42 = vsel %vm632_vm2, %v631_v35, %v629_v39 }
 0x15c   : > { %v637_v45 = vsel %vm636_vm3, %v635_v44, %v633_v42 }
 0x15e   : > { %v613_v38 = vpop.permute.xlu2 %612 }
 0x15f   : > { %v639_v47 = vperm.slane %v613_v38, %v638_v41 }
 0x161   : > { %v641_v51 = vsel %vm640_vm4, %v639_v47, %v637_v45 }
 0x17c   : > { %v619_v49 = vpop.permute.xlu2 %618 }
 0x17d   : > { %v647_v53 = vperm.slane %v619_v49, %v646_v48 }
 0x185   : > { %v616_v43 = vpop.permute.xlu1 %615 }
 0x186   : > { %v643_v46 = vperm.slane %v616_v43, %v642_v40 }
 0x188   : > { %v645_v52 = vsel %vm644_vm5, %v643_v46, %v641_v51 }
 0x189   : > { %v649_v57 = vsel %vm648_vm6, %v647_v53, %v645_v52 }
 0x1a3   : > { %v622_v54 = vpop.permute.xlu1 %621 }
 0x1a4   : > { %v651_v56 = vperm.slane %v622_v54, %v650_v50 }
 0x1a5   : > { %661 = sbr.rel (%p934_p9) target bundleno = 972 (0x3cc), region = 68 }
 0x1a6   : > { %v653_v58 = vsel %vm652_vm7, %v651_v56, %v649_v57 }
 0x1a7   : > { %v655_v59 = vadd.f32 %v653_v58, %v431_v55 }
 0x1a9   : > { %657 = vst.msk [vmem:[#allocation2] sm:$0x1] %vm656_vm8, %v655_v59 }
 0x1aa   : > { %v680_v60 = vld [vmem:[%s1535_s3 + $0x38] sm:$0xff]  ;;  %v679_v62 = vld [vmem:[%s1535_s3 + $0x30] sm:$0xff]  ;;  %v678_v0 = vld [vmem:[%s1535_s3 + $0x28] sm:$0xff]  ;;  %vm681_vm9 = vcmask 523264   ;;  %vm733_vm10 = vcmask 64512   ;;  %vm764_vm11 = vcmask 1043456  }
 0x1ab   : > { %v672_v61 = vld [vmem:[%s1534_s2 + $0x38] sm:$0xff]  ;;  %693 = vmatpush.msra.mxu0 %v680_v60  ;;  %v671_v63 = vld [vmem:[%s1534_s2 + $0x30] sm:$0xff]  ;;  %v670_v1 = vld [vmem:[%s1534_s2 + $0x28] sm:$0xff]  ;;  %vm760_vm12 = vcmask 31744   ;;  %vm796_vm13 = vcmask 0  }
 0x1ac   : > { %716 = vmatpush.msra.mxu1 %v672_v61  ;;  %v677_v2 = vld [vmem:[%s1535_s3 + $0x20] sm:$0xff]  ;;  %v676_v4 = vld [vmem:[%s1535_s3 + $0x18] sm:$0xff]  ;;  %v675_v6 = vld [vmem:[%s1535_s3 + $0x10] sm:$0xff] }
 0x1ad   : > { %694 = vmatpush.msra.mxu0 %v679_v62  ;;  %v669_v3 = vld [vmem:[%s1534_s2 + $0x20] sm:$0xff]  ;;  %v668_v5 = vld [vmem:[%s1534_s2 + $0x18] sm:$0xff]  ;;  %v667_v7 = vld [vmem:[%s1534_s2 + $0x10] sm:$0xff] }
 0x1ae   : > { %717 = vmatpush.msra.mxu1 %v671_v63  ;;  %v674_v9 = vld [vmem:[%s1535_s3 + $0x8] sm:$0xff]  ;;  %v673_v11 = vld [vmem:[%s1535_s3] sm:$0xff] }
 0x1af   : > { %695 = vmatpush.msra.mxu0 %v678_v0  ;;  %v666_v10 = vld [vmem:[%s1534_s2 + $0x8] sm:$0xff]  ;;  %v665_v12 = vld [vmem:[%s1534_s2] sm:$0xff] }
 0x1b0   : > { %718 = vmatpush.msra.mxu1 %v670_v1  ;;  %v662_v8 = vld [vmem:[#allocation2] sm:$0x1]  ;;  %v664_v14 = vld [vmem:[%s413_s15] sm:$0x1] }
 0x1b1   : > { %696 = vmatpush.msra.mxu0 %v677_v2  ;;  %v663_v13 = vmul.f32 0.00390625, %v662_v8  ;;  %v731_v15 = vld [vmem:[%s1537_s5] sm:$0xff] }
 0x1b2   : > { %719 = vmatpush.msra.mxu1 %v669_v3  ;;  %752 = vmatpush.msra.mxu2 %v731_v15  ;;  %v728_v18 = vld [vmem:[%s1568_s30] sm:$0x1] }
 0x1b3   : > { %697 = vmatpush.msra.mxu0 %v676_v4  ;;  %v758_v22 = vld [vmem:[%s1569_s11] sm:$0xf] }
 0x1b4   : > { %720 = vmatpush.msra.mxu1 %v668_v5  ;;  %938 = vmatpush.msk.msra.mxu3 %vm764_vm11, %v758_v22  ;;  %v732_v23 = vld [vmem:[%s1570_s27] sm:$0x1] }
 0x1b5   : > { %698 = vmatpush.msra.mxu0 %v675_v6  ;;  %v759_v27 = vld [vmem:[%s1571_s26] sm:$0x1] }
 0x1b6   : > { %721 = vmatpush.msra.mxu1 %v667_v7 }
 0x1b7   : > { %699 = vmatpush.msra.mxu0 %v674_v9 }
 0x1b8   : > { %722 = vmatpush.msra.mxu1 %v666_v10 }
 0x1b9   : > { %700 = vmatpush.msra.mxu0 %v673_v11 }
 0x1ba   : > { %723 = vmatpush.msra.mxu1 %v665_v12  ;;  %935 = vmatmul.msk.f32.vlgmr.msra.gmra.mxu0 %vm681_vm9, %v664_v14 }
 0x1bb   : > { %936 = vmatmul.msk.f32.vlgmr.msra.gmra.mxu1 %vm681_vm9, %v663_v13 }
 0x237   : > { %v702_v16 = vpop.f32.mrf.mxu0 }
 0x238   : > { %v725_v17 = vpop.f32.mrf.mxu1 }
 0x239   : > { %v726_v19 = vadd.f32 %v725_v17, %v702_v16 }
 0x23b   : > { %v729_v20 = vadd.f32 %v728_v18, %v726_v19 }
 0x23d   : > { %v730_v21 = vmax.f32 %v729_v20, 0.0 }
 0x23f   : > { %937 = vmatmul.msk.f32.vlgmr.msra.gmra.mxu2 %vm733_vm10, %v730_v21 }
 0x2c2   : > { %v754_v24 = vpop.f32.mrf.mxu2 }
 0x2c3   : > { %v755_v25 = vadd.f32 %v754_v24, %v732_v23 }
 0x2c5   : > { %v757_v26 = vmax.f32 %v755_v25, 0.0 }
 0x2c7   : > { %939 = vmatmul.msk.f32.vlgmr.msra.gmra.mxu3 %vm760_vm12, %v757_v26 }
 0x34a   : > { %v785_v28 = vpop.f32.mrf.mxu3 }
 0x34b   : > { %v786_v29 = vadd.f32 %v785_v28, %v759_v27 }
 0x34d   : > { %1052 = vtanh.f32 %v786_v29 }
 0x353   : > { %v1053_v30 = vpop.eup %1052 }
 0x354   : > { %v789_v31 = vmul.f32 %v1053_v30, %v664_v14  ;;  %v792_v32 = vand.u32 2147483647, %v1053_v30 }
 0x356   : > { %v790_v33 = vmax.f32 %v789_v31, 0.0  ;;  %v793_v34 = vsel %vm656_vm8, %v792_v32, 0.0 }
 0x357   : > { %794 = vadd.xlane.f32.xlu0 %v793_v34 }
 0x358   : > { %791 = vst.msk [vmem:[%s1397_s12] sm:$0x1] %vm656_vm8, %v790_v33 }
 0x3ca   : > { %v795_v35 = vpop.xlane.xlu0 %794 }
 0x3cb   : > { %797 = vst.msk [vmem:[%s416_s16] sm:$0x1] %vm796_vm13, %v795_v35 }
 0x3cc PF: > { %s1572_s30 = sld [smem:[#allocation21_spill]]  ;;  %s812_s11 = sshll.u32 %s1397_s12, 4  ;;  %s813_s11 = int_to_ptr.vmem [resolvable:$true] %s812_s11 }
 0x3cd   : > { %s799_s25 = scalar_lea.sflag [#allocation5], %s404_s4 }
 0x3d2   : > { %s810_s24 = scalar_lea.hbm %s1572_s30, %s1194_s20  ;;  %s1104_s9 = scalar_lea.hbm %s1572_s30, 2 }
 0x3d3   : > { %s814_s28 = sshll.u32 %s810_s24, 4  ;;  %s815_s28 = int_to_ptr.hbm [resolvable:$true] %s814_s28 }
 0x3d4   : > { %s1098_s27 = sshra.s32 %s815_s28, 4  ;;  %s1099_s27 = int_to_ptr.hbm [resolvable:$true] %s1098_s27 }
 0x3d5   : > { %s1100_s29 = scalar_lea.hbm %s1099_s27, 1  ;;  %p1105_p0 = scmp.lt.s32.totalorder %s1099_s27, %s1572_s30 }
 0x3d6   : > { %p1101_p10 = scmp.ne.s32.totalorder %s1099_s27, %s1100_s29  ;;  %p1106_p1 = scmp.lt.s32.totalorder %s1104_s9, %s1100_s29 }
 0x3d8   : > { %p1102_p11 = pnand %p1101_p10, %p1350_p12  ;;  %p1107_p4 = por %p1106_p1, %p1105_p0 }
 0x3da   : > { %p1103_p13 = pneg %p1102_p11 }
 0x3dc   : > { %p1108_p5 = pnand %p1107_p4, %p1103_p13 }
 0x3de   : > { %1111 = shalt.err (!%p1108_p5)
}
 0x3df   : > { %944 = dma.vmem_to_hbm [thread:$0]  (%p1350_p12), %s813_s11, 16, %s815_s28, %s799_s25  }
 0x3e0 PF: > { %p955_p6 = scmp.ge.s32.totalorder %s1206_s23, 2  ;;  %s829_s4 = sand.u32 1, %s1166_s13  }
 0x3e1   : > { %s830_s12 = scalar_lea.sflag [#allocation5], %s829_s4 }
 0x3e2   : > { %p951_p8 = pnand %p955_p6, %p1363_p2 }
 0x3e4   : > { %p952_p3 = pneg %p951_p8 }
 0x3e6   : > { %1161 = dma.done.wait (%p952_p3), %s830_s12, 16  }
 0x3e7   : > { %1163 = vsyncadd (%p952_p3), %s830_s12, 4294967280  ;;  %s27_s23 = sadd.s32 1, %s1206_s23   ;;  %s1575_s7 = sld [smem:[#allocation9_spill]] }
 0x3e8   : > { %p24_p7 = scmp.ge.s32.totalorder %s27_s23, 6   ;;  %s1576_s15 = sld [smem:[#allocation14_spill]] }
 0x3e9   : > { %s1577_s8 = sld [smem:[#allocation10_spill]]  ;;  %s1581_s13 = smov %s1170_s14 }
 0x3ea   : > { %s1578_s18 = sld [smem:[#allocation15_spill]]  ;;  %s1583_s16 = smov %s1182_s17 }
 0x3eb   : > { %s1579_s24 = sld [smem:[#allocation11_spill]]  ;;  %s1585_s19 = smov %s1198_s21 }
 0x3ec   : > { %s1580_s11 = sld [smem:[#allocation12_spill]]  ;;  %s1586_s20 = smov %s1202_s22 }
 0x3ed   : > { %s1582_s14 = smov %s1575_s7 }
 0x3ee   :  { %26 = sbr.rel (!%p24_p7) target bundleno = 15 (0xf), region = 131 }
 0x3ef   : > { %s1584_s17 = smov %s1577_s8 }
 0x3f1   : > { %s1587_s21 = smov %s1579_s24 }
 0x3f2   : > { %s1588_s22 = smov %s1580_s11 }
 0x3f3   :  { %841 = vsyncpa [#allocation4], 1 }
 0x3f4   :  { %843 = vsyncpa [#allocation4 + $0x1], 1 }
 0x3f5   :  { %844 = vsyncpa [#allocation5], 1 }
 0x3f6   :  { %846 = vsyncpa [#allocation5 + $0x1], 1 }

</bundles_post_ra>
